<compile_context>
chip_gen: v5e
topology: v5e:2x2
jax: 0.10.0
libtpu: 0.0.40
codegen_flags: <defaults>
</compile_context>

<pallas_src>
import functools

import jax
import jax.numpy as jnp
from jax.experimental import pallas as pl
from jax.experimental.pallas import tpu as pltpu

LANE = 128


def _round_up(n, m):
    return ((n + m - 1) // m) * m


def _pick_tb(B):
    """Batch tile: big enough to amortize per-step overhead, small enough to keep
    >=2 (ideally >=4) grid steps for v7x's two TensorCores and avoid padding waste."""
    tb = _round_up(max(1, -(-B // 4)), 8)
    return max(8, min(2048, tb))


def _ae_forward_kernel(
    x_ref,
    we1_ref, be1_ref, we2_ref, be2_ref,   # encoder params (bf16 W, f32 b)
    wd1_ref, bd1_ref, wd2_ref, bd2_ref,   # decoder params
    z_ref, y_ref,                         # bf16 outputs (padded lane widths)
):
    # In-kernel f32 -> bf16 cast (VPU), avoids a wrapper-side pad+cast HBM round trip.
    x = x_ref[...].astype(jnp.bfloat16)                              # (TB, D_in_pad)

    # ---- encoder ----
    h = jnp.dot(x, we1_ref[...], preferred_element_type=jnp.float32) + be1_ref[...]
    h = jnp.maximum(h, 0.0)                                          # ReLU
    z = jnp.dot(h.astype(jnp.bfloat16), we2_ref[...],
                preferred_element_type=jnp.float32) + be2_ref[...]
    z_bf16 = z.astype(jnp.bfloat16)
    z_ref[...] = z_bf16                                              # returned latent

    # ---- decoder (consumes exactly the returned bf16 latent) ----
    g = jnp.dot(z_bf16, wd1_ref[...],
                preferred_element_type=jnp.float32) + bd1_ref[...]
    g = jnp.maximum(g, 0.0)                                          # ReLU
    y = jnp.dot(g.astype(jnp.bfloat16), wd2_ref[...],
                preferred_element_type=jnp.float32) + bd2_ref[...]
    y_ref[...] = y.astype(y_ref.dtype)


def prepare_kernel_params(p):
    """Zero-pad all feature dims to 128-lane multiples; cast weights to bf16."""
    d_in, d_hid = p["we1"].shape
    d_lat = p["we2"].shape[1]
    d_in_p, d_hid_p, d_lat_p = (_round_up(d, LANE) for d in (d_in, d_hid, d_lat))

    def pad2(w, r, c):
        return jnp.pad(w, ((0, r - w.shape[0]), (0, c - w.shape[1])))

    kp = {
        "we1": pad2(p["we1"], d_in_p,  d_hid_p).astype(jnp.bfloat16),
        "be1": pad2(p["be1"], 1,       d_hid_p).astype(jnp.float32),
        "we2": pad2(p["we2"], d_hid_p, d_lat_p).astype(jnp.bfloat16),
        "be2": pad2(p["be2"], 1,       d_lat_p).astype(jnp.float32),
        "wd1": pad2(p["wd1"], d_lat_p, d_hid_p).astype(jnp.bfloat16),
        "bd1": pad2(p["bd1"], 1,       d_hid_p).astype(jnp.float32),
        "wd2": pad2(p["wd2"], d_hid_p, d_in_p).astype(jnp.bfloat16),
        "bd2": pad2(p["bd2"], 1,       d_in_p).astype(jnp.float32),
    }
    dims = {"d_in": d_in, "d_lat": d_lat}
    return kp, dims


@functools.partial(jax.jit, static_argnames=("d_in", "d_lat", "tb"))
def simclr_ae_forward(x, kp, *, d_in, d_lat, tb=None):
    """Pallas implementation of SimCLRAEModule.forward: returns (z, y)."""
    B = x.shape[0]
    d_in_p, d_hid_p = kp["we1"].shape
    d_lat_p = kp["we2"].shape[1]

    if tb is None:
        tb = _pick_tb(B)
    b_pad = _round_up(max(B, 1), tb)

    # Only pad what is strictly necessary (batch remainder / feature remainder),
    # keeping the original f32 dtype. No copy at all in the common aligned case.
    if b_pad == B and d_in_p == d_in:
        x_in = x
    else:
        x_in = jnp.pad(x, ((0, b_pad - B), (0, d_in_p - d_in)))

    grid = (b_pad // tb,)

    # Weights / biases: same block index every grid step -> stay resident in VMEM.
    resident = lambda shape: pl.BlockSpec(shape, lambda i: (0, 0))

    flops = 2 * b_pad * (d_in_p * d_hid_p + d_hid_p * d_lat_p
                         + d_lat_p * d_hid_p + d_hid_p * d_in_p)
    weight_bytes = sum(int(v.size) * v.dtype.itemsize for v in kp.values())
    bytes_accessed = (int(x_in.size) * x_in.dtype.itemsize
                      + weight_bytes
                      + b_pad * (d_lat_p + d_in_p) * 2)   # bf16 outputs

    z_pad, y_pad = pl.pallas_call(
        _ae_forward_kernel,
        out_shape=(
            jax.ShapeDtypeStruct((b_pad, d_lat_p), jnp.bfloat16),
            jax.ShapeDtypeStruct((b_pad, d_in_p), jnp.bfloat16),
        ),
        grid=grid,
        in_specs=[
            pl.BlockSpec((tb, d_in_p), lambda i: (i, 0)),            # x tile
            resident((d_in_p, d_hid_p)),  resident((1, d_hid_p)),    # we1, be1
            resident((d_hid_p, d_lat_p)), resident((1, d_lat_p)),    # we2, be2
            resident((d_lat_p, d_hid_p)), resident((1, d_hid_p)),    # wd1, bd1
            resident((d_hid_p, d_in_p)),  resident((1, d_in_p)),     # wd2, bd2
        ],
        out_specs=(
            pl.BlockSpec((tb, d_lat_p), lambda i: (i, 0)),
            pl.BlockSpec((tb, d_in_p), lambda i: (i, 0)),
        ),
        compiler_params=pltpu.CompilerParams(
            dimension_semantics=("parallel",),
        ),
        cost_estimate=pl.CostEstimate(
            flops=flops, transcendentals=0, bytes_accessed=bytes_accessed),
    )(
        x_in,
        kp["we1"], kp["be1"], kp["we2"], kp["be2"],
        kp["wd1"], kp["bd1"], kp["wd2"], kp["bd2"],
    )

    z = z_pad[:B, :d_lat].astype(jnp.float32)
    y = y_pad[:B, :d_in].astype(jnp.float32)
    return z, y


def init_params(key, d_in, d_hidden, d_latent):
    """Deterministic synthetic parameter init (Glorot-ish scaling), f32 master copy."""
    ks = jax.random.split(key, 4)

    def lin(k, fan_in, fan_out):
        scale = jnp.sqrt(2.0 / (fan_in + fan_out)).astype(jnp.float32)
        w = scale * jax.random.normal(k, (fan_in, fan_out), dtype=jnp.float32)
        b = jnp.zeros((1, fan_out), dtype=jnp.float32)
        return w, b

    we1, be1 = lin(ks[0], d_in, d_hidden)
    we2, be2 = lin(ks[1], d_hidden, d_latent)
    wd1, bd1 = lin(ks[2], d_latent, d_hidden)
    wd2, bd2 = lin(ks[3], d_hidden, d_in)
    return {
        "we1": we1, "be1": be1, "we2": we2, "be2": be2,
        "wd1": wd1, "bd1": bd1, "wd2": wd2, "bd2": bd2,
    }


def reference_forward(x, p):
    """Pure-JAX f32 reference of the same forward pass (for sanity check)."""
    h = jnp.maximum(x @ p["we1"] + p["be1"], 0.0)
    z = h @ p["we2"] + p["be2"]
    g = jnp.maximum(z @ p["wd1"] + p["bd1"], 0.0)
    y = g @ p["wd2"] + p["bd2"]
    return z, y


if __name__ == "__main__":
    # Small shapes consistent with the module: flattened weight vectors.
    B, D_IN, D_HIDDEN, D_LATENT = 8, 128, 64, 32

    key = jax.random.PRNGKey(0)
    k_x, k_p = jax.random.split(key)

    x = jax.random.normal(k_x, (B, D_IN), dtype=jnp.float32)
    params = init_params(k_p, D_IN, D_HIDDEN, D_LATENT)
    kparams, dims = prepare_kernel_params(params)

    z, y = simclr_ae_forward(x, kparams, d_in=dims["d_in"], d_lat=dims["d_lat"])
    jax.block_until_ready((z, y))

    # Correctness check against pure-JAX f32 reference. Tolerance loosened because
    # the kernel uses bf16 MXU inputs / bf16 outputs with f32 accumulation.
    z_ref, y_ref = reference_forward(x, params)
    assert z.shape == (B, D_LATENT) and y.shape == (B, D_IN)
    assert jnp.allclose(z, z_ref, atol=5e-2, rtol=5e-2)
    assert jnp.allclose(y, y_ref, atol=5e-2, rtol=5e-2)

    print("KERNEL_OK")
</pallas_src>

<mosaic_0001>
module attributes {stable_mosaic.version = 11 : i64} {
  func.func @_ae_forward_kernel(%arg0: i32, %arg1: memref<8x128xf32, #tpu.memory_space<vmem>>, %arg2: memref<128x128xbf16, #tpu.memory_space<vmem>>, %arg3: memref<1x128xf32, #tpu.memory_space<vmem>>, %arg4: memref<128x128xbf16, #tpu.memory_space<vmem>>, %arg5: memref<1x128xf32, #tpu.memory_space<vmem>>, %arg6: memref<128x128xbf16, #tpu.memory_space<vmem>>, %arg7: memref<1x128xf32, #tpu.memory_space<vmem>>, %arg8: memref<128x128xbf16, #tpu.memory_space<vmem>>, %arg9: memref<1x128xf32, #tpu.memory_space<vmem>>, %arg10: memref<8x128xbf16, #tpu.memory_space<vmem>>, %arg11: memref<8x128xbf16, #tpu.memory_space<vmem>>) attributes {dimension_semantics = [#tpu.dimension_semantics<parallel>], iteration_bounds = array<i64: 1>, scalar_prefetch = 0 : i64, scratch_operands = 0 : i64, tpu.core_type = #tpu.core_type<tc>, window_params = [{transform_indices = @transform_0, window_bounds = array<i64: 8, 128>}, {pipeline_mode = #tpu.pipeline_mode<synchronous>, transform_indices = @transform_1, window_bounds = array<i64: 128, 128>}, {pipeline_mode = #tpu.pipeline_mode<synchronous>, transform_indices = @transform_2, window_bounds = array<i64: 1, 128>}, {pipeline_mode = #tpu.pipeline_mode<synchronous>, transform_indices = @transform_3, window_bounds = array<i64: 128, 128>}, {pipeline_mode = #tpu.pipeline_mode<synchronous>, transform_indices = @transform_4, window_bounds = array<i64: 1, 128>}, {pipeline_mode = #tpu.pipeline_mode<synchronous>, transform_indices = @transform_5, window_bounds = array<i64: 128, 128>}, {pipeline_mode = #tpu.pipeline_mode<synchronous>, transform_indices = @transform_6, window_bounds = array<i64: 1, 128>}, {pipeline_mode = #tpu.pipeline_mode<synchronous>, transform_indices = @transform_7, window_bounds = array<i64: 128, 128>}, {pipeline_mode = #tpu.pipeline_mode<synchronous>, transform_indices = @transform_8, window_bounds = array<i64: 1, 128>}, {transform_indices = @transform_9, window_bounds = array<i64: 8, 128>}, {transform_indices = @transform_10, window_bounds = array<i64: 8, 128>}]} {
    %c0 = arith.constant 0 : index
    %c0_0 = arith.constant 0 : index
    %0 = vector.load %arg1[%c0, %c0_0] : memref<8x128xf32, #tpu.memory_space<vmem>>, vector<8x128xf32>
    %1 = arith.truncf %0 : vector<8x128xf32> to vector<8x128xbf16>
    %c0_1 = arith.constant 0 : index
    %c0_2 = arith.constant 0 : index
    %2 = vector.load %arg2[%c0_1, %c0_2] : memref<128x128xbf16, #tpu.memory_space<vmem>>, vector<128x128xbf16>
    %cst = arith.constant dense<0.000000e+00> : vector<8x128xf32>
    %3 = tpu.matmul %1, %2, %cst {dimension_numbers = #tpu.dot_dimension_numbers<[1], [0], [0], [1], [0, 0, 1, 1], [], []>} : vector<8x128xbf16>, vector<128x128xbf16>, vector<8x128xf32> -> vector<8x128xf32>
    %c0_3 = arith.constant 0 : index
    %c0_4 = arith.constant 0 : index
    %4 = vector.load %arg3[%c0_3, %c0_4] : memref<1x128xf32, #tpu.memory_space<vmem>>, vector<1x128xf32>
    %5 = vector.broadcast %4 : vector<1x128xf32> to vector<8x128xf32>
    %6 = arith.addf %3, %5 : vector<8x128xf32>
    %cst_5 = arith.constant 0.000000e+00 : f32
    %7 = vector.broadcast %cst_5 : f32 to vector<8x128xf32>
    %8 = arith.maximumf %6, %7 : vector<8x128xf32>
    %9 = arith.truncf %8 : vector<8x128xf32> to vector<8x128xbf16>
    %c0_6 = arith.constant 0 : index
    %c0_7 = arith.constant 0 : index
    %10 = vector.load %arg4[%c0_6, %c0_7] : memref<128x128xbf16, #tpu.memory_space<vmem>>, vector<128x128xbf16>
    %cst_8 = arith.constant dense<0.000000e+00> : vector<8x128xf32>
    %11 = tpu.matmul %9, %10, %cst_8 {dimension_numbers = #tpu.dot_dimension_numbers<[1], [0], [0], [1], [0, 0, 1, 1], [], []>} : vector<8x128xbf16>, vector<128x128xbf16>, vector<8x128xf32> -> vector<8x128xf32>
    %c0_9 = arith.constant 0 : index
    %c0_10 = arith.constant 0 : index
    %12 = vector.load %arg5[%c0_9, %c0_10] : memref<1x128xf32, #tpu.memory_space<vmem>>, vector<1x128xf32>
    %13 = vector.broadcast %12 : vector<1x128xf32> to vector<8x128xf32>
    %14 = arith.addf %11, %13 : vector<8x128xf32>
    %15 = arith.truncf %14 : vector<8x128xf32> to vector<8x128xbf16>
    %c0_11 = arith.constant 0 : index
    %c0_12 = arith.constant 0 : index
    %16 = vector.load %arg10[%c0_11, %c0_12] : memref<8x128xbf16, #tpu.memory_space<vmem>>, vector<8x128xbf16>
    tpu.vector_store %arg10[%c0_11, %c0_12], %15 {strides = array<i32>} : memref<8x128xbf16, #tpu.memory_space<vmem>>, vector<8x128xbf16>,
    %c0_13 = arith.constant 0 : index
    %c0_14 = arith.constant 0 : index
    %17 = vector.load %arg6[%c0_13, %c0_14] : memref<128x128xbf16, #tpu.memory_space<vmem>>, vector<128x128xbf16>
    %cst_15 = arith.constant dense<0.000000e+00> : vector<8x128xf32>
    %18 = tpu.matmul %15, %17, %cst_15 {dimension_numbers = #tpu.dot_dimension_numbers<[1], [0], [0], [1], [0, 0, 1, 1], [], []>} : vector<8x128xbf16>, vector<128x128xbf16>, vector<8x128xf32> -> vector<8x128xf32>
    %c0_16 = arith.constant 0 : index
    %c0_17 = arith.constant 0 : index
    %19 = vector.load %arg7[%c0_16, %c0_17] : memref<1x128xf32, #tpu.memory_space<vmem>>, vector<1x128xf32>
    %20 = vector.broadcast %19 : vector<1x128xf32> to vector<8x128xf32>
    %21 = arith.addf %18, %20 : vector<8x128xf32>
    %cst_18 = arith.constant 0.000000e+00 : f32
    %22 = vector.broadcast %cst_18 : f32 to vector<8x128xf32>
    %23 = arith.maximumf %21, %22 : vector<8x128xf32>
    %24 = arith.truncf %23 : vector<8x128xf32> to vector<8x128xbf16>
    %c0_19 = arith.constant 0 : index
    %c0_20 = arith.constant 0 : index
    %25 = vector.load %arg8[%c0_19, %c0_20] : memref<128x128xbf16, #tpu.memory_space<vmem>>, vector<128x128xbf16>
    %cst_21 = arith.constant dense<0.000000e+00> : vector<8x128xf32>
    %26 = tpu.matmul %24, %25, %cst_21 {dimension_numbers = #tpu.dot_dimension_numbers<[1], [0], [0], [1], [0, 0, 1, 1], [], []>} : vector<8x128xbf16>, vector<128x128xbf16>, vector<8x128xf32> -> vector<8x128xf32>
    %c0_22 = arith.constant 0 : index
    %c0_23 = arith.constant 0 : index
    %27 = vector.load %arg9[%c0_22, %c0_23] : memref<1x128xf32, #tpu.memory_space<vmem>>, vector<1x128xf32>
    %28 = vector.broadcast %27 : vector<1x128xf32> to vector<8x128xf32>
    %29 = arith.addf %26, %28 : vector<8x128xf32>
    %30 = arith.truncf %29 : vector<8x128xf32> to vector<8x128xbf16>
    %c0_24 = arith.constant 0 : index
    %c0_25 = arith.constant 0 : index
    %31 = vector.load %arg11[%c0_24, %c0_25] : memref<8x128xbf16, #tpu.memory_space<vmem>>, vector<8x128xbf16>
    tpu.vector_store %arg11[%c0_24, %c0_25], %30 {strides = array<i32>} : memref<8x128xbf16, #tpu.memory_space<vmem>>, vector<8x128xbf16>,
    return
  }
  func.func @transform_0(%arg0: i32) -> (i32, i32) {
    %c0_i32 = arith.constant 0 : i32
    %c0_i32_0 = arith.constant 0 : i32
    return %arg0, %c0_i32 : i32, i32
  }
  func.func @transform_1(%arg0: i32) -> (i32, i32) {
    %c0_i32 = arith.constant 0 : i32
    %c0_i32_0 = arith.constant 0 : i32
    %c0_i32_1 = arith.constant 0 : i32
    return %c0_i32, %c0_i32_0 : i32, i32
  }
  func.func @transform_2(%arg0: i32) -> (i32, i32) {
    %c0_i32 = arith.constant 0 : i32
    %c0_i32_0 = arith.constant 0 : i32
    %c0_i32_1 = arith.constant 0 : i32
    return %c0_i32, %c0_i32_0 : i32, i32
  }
  func.func @transform_3(%arg0: i32) -> (i32, i32) {
    %c0_i32 = arith.constant 0 : i32
    %c0_i32_0 = arith.constant 0 : i32
    %c0_i32_1 = arith.constant 0 : i32
    return %c0_i32, %c0_i32_0 : i32, i32
  }
  func.func @transform_4(%arg0: i32) -> (i32, i32) {
    %c0_i32 = arith.constant 0 : i32
    %c0_i32_0 = arith.constant 0 : i32
    %c0_i32_1 = arith.constant 0 : i32
    return %c0_i32, %c0_i32_0 : i32, i32
  }
  func.func @transform_5(%arg0: i32) -> (i32, i32) {
    %c0_i32 = arith.constant 0 : i32
    %c0_i32_0 = arith.constant 0 : i32
    %c0_i32_1 = arith.constant 0 : i32
    return %c0_i32, %c0_i32_0 : i32, i32
  }
  func.func @transform_6(%arg0: i32) -> (i32, i32) {
    %c0_i32 = arith.constant 0 : i32
    %c0_i32_0 = arith.constant 0 : i32
    %c0_i32_1 = arith.constant 0 : i32
    return %c0_i32, %c0_i32_0 : i32, i32
  }
  func.func @transform_7(%arg0: i32) -> (i32, i32) {
    %c0_i32 = arith.constant 0 : i32
    %c0_i32_0 = arith.constant 0 : i32
    %c0_i32_1 = arith.constant 0 : i32
    return %c0_i32, %c0_i32_0 : i32, i32
  }
  func.func @transform_8(%arg0: i32) -> (i32, i32) {
    %c0_i32 = arith.constant 0 : i32
    %c0_i32_0 = arith.constant 0 : i32
    %c0_i32_1 = arith.constant 0 : i32
    return %c0_i32, %c0_i32_0 : i32, i32
  }
  func.func @transform_9(%arg0: i32) -> (i32, i32) {
    %c0_i32 = arith.constant 0 : i32
    %c0_i32_0 = arith.constant 0 : i32
    return %arg0, %c0_i32 : i32, i32
  }
  func.func @transform_10(%arg0: i32) -> (i32, i32) {
    %c0_i32 = arith.constant 0 : i32
    %c0_i32_0 = arith.constant 0 : i32
    return %arg0, %c0_i32 : i32, i32
  }
}

</mosaic_0001>

<bundles_post_ra>
// kernel: simclr_ae_forward.1
= control target key start
LH: loop header
LB: loop body
LE: loop exit
PB: predicated region body
PF: predicated region fallthrough
CT: control target
= control target key end

     0   :  { %16 = vsyncpa [#allocation3], 0  ;;  %s941_s0 = inlined_call_operand.hbm [shape: f32[8,128], index: 0, kind: input, shape index: {}]   ;;  %s942_s1 = inlined_call_operand.hbm [shape: bf16[128,128], index: 1, kind: input, shape index: {}]   ;;  %s943_s2 = inlined_call_operand.vmem [shape: f32[1,128], index: 2, kind: input, shape index: {}]   ;;  %s944_s3 = inlined_call_operand.hbm [shape: bf16[128,128], index: 3, kind: input, shape index: {}]   ;;  %s945_s4 = inlined_call_operand.vmem [shape: f32[1,128], index: 4, kind: input, shape index: {}]   ;;  %s946_s5 = inlined_call_operand.hbm [shape: bf16[128,128], index: 5, kind: input, shape index: {}]   ;;  %s947_s6 = inlined_call_operand.hbm [shape: f32[1,128], index: 6, kind: input, shape index: {}]   ;;  %s948_s7 = inlined_call_operand.hbm [shape: bf16[128,128], index: 7, kind: input, shape index: {}]   ;;  %s949_s8 = inlined_call_operand.hbm [shape: f32[1,128], index: 8, kind: input, shape index: {}]   ;;  %s950_s9 = inlined_call_operand.vmem [shape: bf16[8,128], index: 9, kind: output, shape index: {0}]   ;;  %s951_s10 = inlined_call_operand.vmem [shape: bf16[8,128], index: 10, kind: output, shape index: {1}]  }
   0x1   :  { %17 = vsyncpa [#allocation5], 0 }
   0x2   :  { %18 = vsyncpa [#allocation8], 0  ;;  %s35_s15 = sshll.u32 %s942_s1, 4  ;;  %s36_s15 = int_to_ptr.hbm [resolvable:$true] %s35_s15 }
   0x3   :  { %19 = vsyncpa [#allocation11], 0  ;;  %s832_s16 = smov [#allocation4]   ;;  %s65_s20 = sshll.u32 %s946_s5, 4  ;;  %s66_s20 = int_to_ptr.hbm [resolvable:$true] %s65_s20 }
   0x4   :  { %s37_s17 = sshll.u32 %s832_s16, 4  ;;  %s833_s21 = smov 64   ;;  %s38_s17 = int_to_ptr.vmem [resolvable:$true] %s37_s17 }
   0x5   :  { %s834_s22 = smov 4   ;;  %s835_s23 = smov [#allocation7]  }
   0x6   :  { %43 = dma.hbm_to_vmem [thread:$0]  %s36_s15, 1024, %s38_s17, [#allocation5], %s833_s21, %s833_s21, %s834_s22  }
   0x7   :  { %s67_s24 = sshll.u32 %s835_s23, 4  ;;  %s89_s26 = sshll.u32 %s948_s7, 4  ;;  %s68_s24 = int_to_ptr.vmem [resolvable:$true] %s67_s24  ;;  %s90_s26 = int_to_ptr.hbm [resolvable:$true] %s89_s26 }
   0x8   :  { %73 = dma.hbm_to_vmem [thread:$0]  %s66_s20, 1024, %s68_s24, [#allocation8], %s833_s21, %s833_s21, %s834_s22  }
   0x9   :  { %s25_s28 = sshll.u32 %s941_s0, 4  ;;  %s836_s29 = smov [#allocation10]   ;;  %s26_s28 = int_to_ptr.hbm [resolvable:$true] %s25_s28 }
   0xa   :  { %s91_s30 = sshll.u32 %s836_s29, 4  ;;  %s837_s11 = smov [#allocation2]   ;;  %s92_s30 = int_to_ptr.vmem [resolvable:$true] %s91_s30 }
   0xb   :  { %97 = dma.hbm_to_vmem [thread:$0]  %s90_s26, 1024, %s92_s30, [#allocation11], %s833_s21, %s833_s21, %s834_s22  }
   0xc   :  { %s27_s7 = sshll.u32 %s837_s11, 4  ;;  %s50_s14 = sshll.u32 %s944_s3, 4  ;;  %s28_s7 = int_to_ptr.vmem [resolvable:$true] %s27_s7  ;;  %s51_s14 = int_to_ptr.hbm [resolvable:$true] %s50_s14 }
   0xd   :  { %30 = dma.hbm_to_vmem [thread:$0]  %s26_s28, 128, %s28_s7, [#allocation3]  }
   0xe   :  { %s79_s0 = sshll.u32 %s947_s6, 4  ;;  %s838_s17 = smov [#allocation6]   ;;  %s80_s0 = int_to_ptr.hbm [resolvable:$true] %s79_s0 }
   0xf   :  { %s52_s18 = sshll.u32 %s838_s17, 4  ;;  %s839_s19 = smov [#allocation9]   ;;  %s53_s18 = int_to_ptr.vmem [resolvable:$true] %s52_s18 }
  0x10   :  { %58 = dma.hbm_to_vmem [thread:$0]  %s51_s14, 1024, %s53_s18, [#allocation5], %s833_s21, %s833_s21, %s834_s22  }
  0x11   :  { %s81_s20 = sshll.u32 %s839_s19, 4  ;;  %s103_s3 = sshll.u32 %s949_s8, 4  ;;  %s82_s20 = int_to_ptr.vmem [resolvable:$true] %s81_s20  ;;  %s104_s3 = int_to_ptr.hbm [resolvable:$true] %s103_s3 }
  0x12   :  { %84 = dma.hbm_to_vmem [thread:$0]  %s80_s0, 16, %s82_s20, [#allocation8]  }
  0x13   :  { %s840_s25 = smov [#allocation12]  }
  0x14   :  { %s105_s1 = sshll.u32 %s840_s25, 4  ;;  %s106_s1 = int_to_ptr.vmem [resolvable:$true] %s105_s1 }
  0x15   :  { %108 = dma.hbm_to_vmem [thread:$0]  %s104_s3, 16, %s106_s1, [#allocation11]  }
  0x16   :  { %824 = dma.done.wait [#allocation3], 128  }
  0x17   :  { %825 = vsyncadd [#allocation3], 4294967168 }
  0x18   :  { %826 = dma.done.wait [#allocation5], 2048  }
  0x19   :  { %827 = vsyncadd [#allocation5], 4294965248 }
  0x1a   :  { %828 = dma.done.wait [#allocation8], 1040  }
  0x1b   :  { %829 = vsyncadd [#allocation8], 4294966256 }
  0x1c   :  { %830 = dma.done.wait [#allocation11], 1040  }
  0x1d   :  { %831 = vsyncadd [#allocation11], 4294966256  ;;  %v618_v0 = vld [vmem:[#allocation4 + $0x38] sm:$0xff]  ;;  %v617_v1 = vld [vmem:[#allocation4 + $0x30] sm:$0xff] }
  0x1e   :  { %207 = vmatpush.bf16.msra.mxu0 %v618_v0  ;;  %v626_v2 = vld [vmem:[#allocation6 + $0x38] sm:$0xff]  ;;  %v625_v3 = vld [vmem:[#allocation6 + $0x30] sm:$0xff]  ;;  %v616_v4 = vld [vmem:[#allocation4 + $0x28] sm:$0xff] }
  0x1f   :  { %290 = vmatpush.bf16.msra.mxu1 %v626_v2  ;;  %v624_v5 = vld [vmem:[#allocation6 + $0x28] sm:$0xff]  ;;  %v615_v6 = vld [vmem:[#allocation4 + $0x20] sm:$0xff]  ;;  %v614_v8 = vld [vmem:[#allocation4 + $0x18] sm:$0xff] }
  0x20   :  { %v623_v7 = vld [vmem:[#allocation6 + $0x20] sm:$0xff]  ;;  %v622_v9 = vld [vmem:[#allocation6 + $0x18] sm:$0xff]  ;;  %v613_v10 = vld [vmem:[#allocation4 + $0x10] sm:$0xff] }
  0x21   :  { %v621_v11 = vld [vmem:[#allocation6 + $0x10] sm:$0xff]  ;;  %v612_v12 = vld [vmem:[#allocation4 + $0x8] sm:$0xff]  ;;  %v611_v13 = vld [vmem:[#allocation4] sm:$0xff] }
  0x22   :  { %208 = vmatpush.bf16.msra.mxu0 %v617_v1  ;;  %v137_v14 = vld [vmem:[#allocation2] sm:$0xff]  ;;  %v620_v16 = vld [vmem:[#allocation6 + $0x8] sm:$0xff]  ;;  %v619_v17 = vld [vmem:[#allocation6] sm:$0xff] }
  0x23   :  { %291 = vmatpush.bf16.msra.mxu1 %v625_v3  ;;  %v138_v15 = vpack.c.bf16 %v137_v14, %v137_v14  ;;  %v634_v18 = vld [vmem:[#allocation7 + $0x38] sm:$0xff]  ;;  %v633_v19 = vld [vmem:[#allocation7 + $0x30] sm:$0xff]  ;;  %v632_v20 = vld [vmem:[#allocation7 + $0x28] sm:$0xff] }
  0x24   :  { %373 = vmatpush.bf16.msra.mxu2 %v634_v18  ;;  %v631_v21 = vld [vmem:[#allocation7 + $0x20] sm:$0xff]  ;;  %v630_v22 = vld [vmem:[#allocation7 + $0x18] sm:$0xff]  ;;  %v629_v23 = vld [vmem:[#allocation7 + $0x10] sm:$0xff] }
  0x25   :  { %v652_v24 = vld [vmem:[%s943_s2] ss:$0 sm:$0xff]  ;;  %v628_v25 = vld [vmem:[#allocation7 + $0x8] sm:$0xff]  ;;  %v627_v31 = vld [vmem:[#allocation7] sm:$0xff] }
  0x26   :  { %209 = vmatpush.bf16.msra.mxu0 %v616_v4  ;;  %v642_v32 = vld [vmem:[#allocation10 + $0x38] sm:$0xff]  ;;  %v641_v33 = vld [vmem:[#allocation10 + $0x30] sm:$0xff]  ;;  %v640_v34 = vld [vmem:[#allocation10 + $0x28] sm:$0xff] }
  0x27   :  { %292 = vmatpush.bf16.msra.mxu1 %v624_v5  ;;  %456 = vmatpush.bf16.msra.mxu3 %v642_v32  ;;  %v639_v35 = vld [vmem:[#allocation10 + $0x20] sm:$0xff]  ;;  %v638_v36 = vld [vmem:[#allocation10 + $0x18] sm:$0xff]  ;;  %v637_v37 = vld [vmem:[#allocation10 + $0x10] sm:$0xff] }
  0x28   :  { %374 = vmatpush.bf16.msra.mxu2 %v633_v19  ;;  %v653_v38 = vld [vmem:[%s945_s4] ss:$0 sm:$0xff]  ;;  %v636_v43 = vld [vmem:[#allocation10 + $0x8] sm:$0xff]  ;;  %v635_v44 = vld [vmem:[#allocation10] sm:$0xff] }
  0x29   :  { %v654_v45 = vld [vmem:[#allocation9] ss:$0 sm:$0xff]  ;;  %v655_v51 = vld [vmem:[#allocation12] ss:$0 sm:$0xff] }
  0x2a   :  { %210 = vmatpush.bf16.msra.mxu0 %v615_v6 }
  0x2b   :  { %293 = vmatpush.bf16.msra.mxu1 %v623_v7  ;;  %457 = vmatpush.bf16.msra.mxu3 %v641_v33 }
  0x2c   :  { %375 = vmatpush.bf16.msra.mxu2 %v632_v20 }
  0x2e   :  { %211 = vmatpush.bf16.msra.mxu0 %v614_v8 }
  0x2f   :  { %294 = vmatpush.bf16.msra.mxu1 %v622_v9  ;;  %458 = vmatpush.bf16.msra.mxu3 %v640_v34 }
  0x30   :  { %376 = vmatpush.bf16.msra.mxu2 %v631_v21 }
  0x32   :  { %212 = vmatpush.bf16.msra.mxu0 %v613_v10 }
  0x33   :  { %295 = vmatpush.bf16.msra.mxu1 %v621_v11  ;;  %459 = vmatpush.bf16.msra.mxu3 %v639_v35 }
  0x34   :  { %377 = vmatpush.bf16.msra.mxu2 %v630_v22 }
  0x36   :  { %213 = vmatpush.bf16.msra.mxu0 %v612_v12 }
  0x37   :  { %296 = vmatpush.bf16.msra.mxu1 %v620_v16  ;;  %460 = vmatpush.bf16.msra.mxu3 %v638_v36 }
  0x38   :  { %378 = vmatpush.bf16.msra.mxu2 %v629_v23 }
  0x3a   :  { %214 = vmatpush.bf16.msra.mxu0 %v611_v13 }
  0x3b   :  { %297 = vmatpush.bf16.msra.mxu1 %v619_v17  ;;  %461 = vmatpush.bf16.msra.mxu3 %v637_v37 }
  0x3c   :  { %379 = vmatpush.bf16.msra.mxu2 %v628_v25 }
  0x3d   :  { %215 = vmatmul.bf16.vlgmr.msra.gmra.mxu0 %v138_v15 }
  0x3f   :  { %462 = vmatpush.bf16.msra.mxu3 %v636_v43 }
  0x40   :  { %380 = vmatpush.bf16.msra.mxu2 %v627_v31 }
  0x43   :  { %463 = vmatpush.bf16.msra.mxu3 %v635_v44 }
  0xba   :  { %v216_v26 = vpop.f32.mrf.mxu0 }
  0xbb   :  { %v217_v27 = vadd.f32 %v652_v24, %v216_v26 }
  0xbd   :  { %v220_v28 = vmax.f32 %v217_v27, 0.0 }
  0xbf   :  { %v221_v29 = vpack.c.bf16 %v220_v28, %v220_v28 }
  0xc1   :  { %298 = vmatmul.bf16.vlgmr.msra.gmra.mxu1 %v221_v29 }
  0xc2   :  { %v218_v30 = vpop.f32.mrf.mxu0 }
 0x13e   :  { %v299_v39 = vpop.f32.mrf.mxu1 }
 0x13f   :  { %v300_v40 = vadd.f32 %v653_v38, %v299_v39 }
 0x141   :  { %v303_v41 = vpack.c.bf16 %v300_v40, %v300_v40 }
 0x143   :  { %304 = vst [vmem:[%s950_s9] sm:$0xf] %v303_v41  ;;  %381 = vmatmul.bf16.vlgmr.msra.gmra.mxu2 %v303_v41 }
 0x146   :  { %v301_v42 = vpop.f32.mrf.mxu1 }
 0x1c6   :  { %v382_v46 = vpop.f32.mrf.mxu2 }
 0x1c7   :  { %v383_v47 = vadd.f32 %v654_v45, %v382_v46 }
 0x1c9   :  { %v386_v48 = vmax.f32 %v383_v47, 0.0 }
 0x1cb   :  { %v387_v49 = vpack.c.bf16 %v386_v48, %v386_v48 }
 0x1cd   :  { %464 = vmatmul.bf16.vlgmr.msra.gmra.mxu3 %v387_v49 }
 0x1ce   :  { %v384_v50 = vpop.f32.mrf.mxu2 }
 0x250   :  { %v465_v52 = vpop.f32.mrf.mxu3 }
 0x251   :  { %v466_v53 = vadd.f32 %v655_v51, %v465_v52 }
 0x253   :  { %v469_v54 = vpack.c.bf16 %v466_v53, %v466_v53 }
 0x255   :  { %470 = vst [vmem:[%s951_s10] sm:$0xf] %v469_v54 }
 0x258   :  { %v467_v55 = vpop.f32.mrf.mxu3 }
 0x259   :  { %479 = vsyncpa [#allocation3], 1 }
 0x25a   :  { %480 = vsyncpa [#allocation5], 1 }
 0x25b   :  { %481 = vsyncpa [#allocation8], 1 }
 0x25c   :  { %482 = vsyncpa [#allocation11], 1 }

</bundles_post_ra>
